<compile_context>
chip_gen: v6e
topology: v6e:2x2x1
jax: 0.10.0
libtpu: 0.0.40
codegen_flags: <defaults>
</compile_context>

<pallas_src>
import jax
import jax.numpy as jnp
from jax.experimental import pallas as pl
from jax.experimental.pallas import tpu as pltpu

INPUT_SIZE = 512
HIDDEN_SIZE = 128


def prepare_params(w_ih, w_hh, b_ih, b_hh):
    """One-time parameter prep.

    w_ih: (4H, IN)  w_hh: (4H, H)  b_ih, b_hh: (4H,)   (PyTorch gate order i,f,g,o)
    Returns:
      w_ih_t: (IN, 4H)  w_hh_t: (H, 4H)  b: (1, 4H)    (gate order i,f,o,g)
    """
    H = HIDDEN_SIZE

    def reorder_rows(m):  # [i, f, g, o] -> [i, f, o, g] along axis 0
        return jnp.concatenate([m[: 2 * H], m[3 * H: 4 * H], m[2 * H: 3 * H]], axis=0)

    w_ih_t = jnp.transpose(reorder_rows(w_ih)).astype(jnp.float32)      # (IN, 4H)
    w_hh_t = jnp.transpose(reorder_rows(w_hh)).astype(jnp.float32)      # (H, 4H)
    b = reorder_rows(b_ih.astype(jnp.float32) + b_hh.astype(jnp.float32))
    return w_ih_t, w_hh_t, b.reshape(1, 4 * H)


def _lstm_seq_kernel(h0_ref, c0_ref, x_ref, wih_ref, whh_ref, b_ref,
                     hseq_ref, hfin_ref, cfin_ref, h_scr, c_scr, gx_scr):
    chunk = pl.program_id(0)
    H = HIDDEN_SIZE
    Tc, B, IN = x_ref.shape

    # Load the initial state into resident VMEM scratch on the first chunk.
    @pl.when(chunk == 0)
    def _():
        h_scr[...] = h0_ref[...].astype(jnp.float32)
        c_scr[...] = c0_ref[...].astype(jnp.float32)

    # Chunk-level input projection (off the serial path): one MXU matmul with
    # M = Tc*B, K = 512, N = 512, f32 accumulation, bias folded in.
    x2d = x_ref[...].reshape(Tc * B, IN)
    gx = jnp.dot(x2d, wih_ref[...], preferred_element_type=jnp.float32) + b_ref[...]
    gx_scr[...] = gx.reshape(Tc, B, 4 * H)

    whh = whh_ref[...]  # (H, 4H) f32, hoisted out of the inner loop

    def step(i, carry):
        h, c = carry
        # Recurrent gate matmul: K = 128 only.
        gates = gx_scr[i] + jnp.dot(h, whh, preferred_element_type=jnp.float32)
        # Gate order [i, f, o, g]: one sigmoid over 3H lanes, one tanh over H.
        sig = jax.nn.sigmoid(gates[:, : 3 * H])
        i_g = sig[:, 0:H]
        f_g = sig[:, H: 2 * H]
        o_g = sig[:, 2 * H: 3 * H]
        g_g = jnp.tanh(gates[:, 3 * H: 4 * H])

        c_new = f_g * c + i_g * g_g
        h_new = o_g * jnp.tanh(c_new)
        hseq_ref[i] = h_new.astype(hseq_ref.dtype)
        return h_new, c_new

    h_fin, c_fin = jax.lax.fori_loop(
        0, Tc, step, (h_scr[...], c_scr[...]), unroll=True)
    h_scr[...] = h_fin
    c_scr[...] = c_fin

    # Only the last chunk needs to publish the final state.
    @pl.when(chunk == pl.num_programs(0) - 1)
    def _():
        hfin_ref[...] = h_fin.astype(hfin_ref.dtype)
        cfin_ref[...] = c_fin.astype(cfin_ref.dtype)


def lstm_sequence(xs, h0, c0, w_ih_t, w_hh_t, b, *, time_chunk=8):
    """Run the LSTM cell over xs: (T, B, IN) inside one kernel.

    Returns (h_seq (T,B,H), h_T (B,H), c_T (B,H)), all float32.
    """
    T, B, IN = xs.shape
    H = HIDDEN_SIZE
    assert IN == INPUT_SIZE

    # Pad batch to a multiple of 8 (sublane tile) if necessary.
    B_pad = max(8, ((B + 7) // 8) * 8)
    if B_pad != B:
        xs = jnp.pad(xs, ((0, 0), (0, B_pad - B), (0, 0)))
        h0 = jnp.pad(h0, ((0, B_pad - B), (0, 0)))
        c0 = jnp.pad(c0, ((0, B_pad - B), (0, 0)))

    # Largest time-chunk <= time_chunk that divides T (worst case 1).
    tc = max(1, min(time_chunk, T))
    while T % tc:
        tc -= 1

    h_seq, h_T, c_T = pl.pallas_call(
        _lstm_seq_kernel,
        out_shape=(
            jax.ShapeDtypeStruct((T, B_pad, H), jnp.float32),
            jax.ShapeDtypeStruct((B_pad, H), jnp.float32),
            jax.ShapeDtypeStruct((B_pad, H), jnp.float32),
        ),
        grid=(T // tc,),
        in_specs=[
            pl.BlockSpec((B_pad, H), lambda t: (0, 0)),                    # h0 (resident)
            pl.BlockSpec((B_pad, H), lambda t: (0, 0)),                    # c0 (resident)
            pl.BlockSpec((tc, B_pad, INPUT_SIZE), lambda t: (t, 0, 0)),    # x chunk (streamed)
            pl.BlockSpec((INPUT_SIZE, 4 * H), lambda t: (0, 0)),           # W_ih^T (resident)
            pl.BlockSpec((H, 4 * H), lambda t: (0, 0)),                    # W_hh^T (resident)
            pl.BlockSpec((1, 4 * H), lambda t: (0, 0)),                    # bias (resident)
        ],
        out_specs=(
            pl.BlockSpec((tc, B_pad, H), lambda t: (t, 0, 0)),             # h per step
            pl.BlockSpec((B_pad, H), lambda t: (0, 0)),                    # final h
            pl.BlockSpec((B_pad, H), lambda t: (0, 0)),                    # final c
        ),
        scratch_shapes=[
            pltpu.VMEM((B_pad, H), jnp.float32),                           # h carry
            pltpu.VMEM((B_pad, H), jnp.float32),                           # c carry
            pltpu.VMEM((tc, B_pad, 4 * H), jnp.float32),                   # per-chunk gx
        ],
        compiler_params=pltpu.CompilerParams(
            dimension_semantics=("arbitrary",),                            # sequential carry
        ),
    )(h0, c0, xs, w_ih_t, w_hh_t, b)

    if B_pad != B:
        h_seq, h_T, c_T = h_seq[:, :B], h_T[:B], c_T[:B]
    return h_seq, h_T, c_T


def lstm_cell(x, hc, w_ih_t, w_hh_t, b):
    """Module-equivalent forward: x (B, IN), hc = (h0, c0) -> (h1, c1)."""
    h0, c0 = hc
    _, h1, c1 = lstm_sequence(x[None], h0, c0, w_ih_t, w_hh_t, b, time_chunk=1)
    return h1, c1


def _ref_step(x, h, c, w_ih, w_hh, b_ih, b_hh):
    gates = x @ w_ih.T + b_ih + h @ w_hh.T + b_hh
    i, f, g, o = jnp.split(gates, 4, axis=1)
    i, f, g, o = jax.nn.sigmoid(i), jax.nn.sigmoid(f), jnp.tanh(g), jax.nn.sigmoid(o)
    c_new = f * c + i * g
    h_new = o * jnp.tanh(c_new)
    return h_new, c_new


if __name__ == "__main__":
    key = jax.random.PRNGKey(0)
    kx, kxs, kh, kc, k1, k2, k3, k4 = jax.random.split(key, 8)

    B, T = 8, 8
    x = jax.random.normal(kx, (B, INPUT_SIZE), dtype=jnp.float32)
    xs = jax.random.normal(kxs, (T, B, INPUT_SIZE), dtype=jnp.float32)
    h0 = jax.random.normal(kh, (B, HIDDEN_SIZE), dtype=jnp.float32)
    c0 = jax.random.normal(kc, (B, HIDDEN_SIZE), dtype=jnp.float32)

    bound = 1.0 / jnp.sqrt(jnp.float32(HIDDEN_SIZE))
    w_ih = jax.random.uniform(k1, (4 * HIDDEN_SIZE, INPUT_SIZE),
                              minval=-bound, maxval=bound, dtype=jnp.float32)
    w_hh = jax.random.uniform(k2, (4 * HIDDEN_SIZE, HIDDEN_SIZE),
                              minval=-bound, maxval=bound, dtype=jnp.float32)
    b_ih = jax.random.uniform(k3, (4 * HIDDEN_SIZE,),
                              minval=-bound, maxval=bound, dtype=jnp.float32)
    b_hh = jax.random.uniform(k4, (4 * HIDDEN_SIZE,),
                              minval=-bound, maxval=bound, dtype=jnp.float32)

    w_ih_t, w_hh_t, b_sum = prepare_params(w_ih, w_hh, b_ih, b_hh)

    # ---- 1) Module-forward semantics: single LSTMCell step ----
    h1, c1 = lstm_cell(x, (h0, c0), w_ih_t, w_hh_t, b_sum)
    jax.block_until_ready((h1, c1))

    h_ref, c_ref = _ref_step(x, h0, c0, w_ih, w_hh, b_ih, b_hh)
    assert jnp.allclose(h1, h_ref, atol=2e-5), "h mismatch (single step)"
    assert jnp.allclose(c1, c_ref, atol=2e-5), "c mismatch (single step)"

    # ---- 2) Full sequence, time-chunked recurrence inside one kernel ----
    h_seq, h_T, c_T = lstm_sequence(xs, h0, c0, w_ih_t, w_hh_t, b_sum, time_chunk=8)
    jax.block_until_ready((h_seq, h_T, c_T))

    def scan_step(carry, x_t):
        h, c = carry
        h, c = _ref_step(x_t, h, c, w_ih, w_hh, b_ih, b_hh)
        return (h, c), h

    (h_T_ref, c_T_ref), h_seq_ref = jax.lax.scan(scan_step, (h0, c0), xs)
    assert jnp.allclose(h_seq, h_seq_ref, atol=1e-4), "h_seq mismatch"
    assert jnp.allclose(h_T, h_T_ref, atol=1e-4), "h_T mismatch"
    assert jnp.allclose(c_T, c_T_ref, atol=1e-4), "c_T mismatch"

    print("KERNEL_OK")
</pallas_src>

<mosaic_0001>
module attributes {stable_mosaic.version = 11 : i64} {
  func.func @_lstm_seq_kernel(%arg0: i32, %arg1: memref<8x128xf32, #tpu.memory_space<vmem>>, %arg2: memref<8x128xf32, #tpu.memory_space<vmem>>, %arg3: memref<1x8x512xf32, #tpu.memory_space<vmem>>, %arg4: memref<512x512xf32, #tpu.memory_space<vmem>>, %arg5: memref<128x512xf32, #tpu.memory_space<vmem>>, %arg6: memref<1x512xf32, #tpu.memory_space<vmem>>, %arg7: memref<1x8x128xf32, #tpu.memory_space<vmem>>, %arg8: memref<8x128xf32, #tpu.memory_space<vmem>>, %arg9: memref<8x128xf32, #tpu.memory_space<vmem>>, %arg10: memref<8x128xf32, #tpu.memory_space<vmem>>, %arg11: memref<8x128xf32, #tpu.memory_space<vmem>>, %arg12: memref<1x8x512xf32, #tpu.memory_space<vmem>>) attributes {dimension_semantics = [#tpu.dimension_semantics<arbitrary>], iteration_bounds = array<i64: 1>, scalar_prefetch = 0 : i64, scratch_operands = 3 : i64, tpu.core_type = #tpu.core_type<tc>, window_params = [{pipeline_mode = #tpu.pipeline_mode<synchronous>, transform_indices = @transform_0, window_bounds = array<i64: 8, 128>}, {pipeline_mode = #tpu.pipeline_mode<synchronous>, transform_indices = @transform_1, window_bounds = array<i64: 8, 128>}, {transform_indices = @transform_2, window_bounds = array<i64: 1, 8, 512>}, {pipeline_mode = #tpu.pipeline_mode<synchronous>, transform_indices = @transform_3, window_bounds = array<i64: 512, 512>}, {pipeline_mode = #tpu.pipeline_mode<synchronous>, transform_indices = @transform_4, window_bounds = array<i64: 128, 512>}, {pipeline_mode = #tpu.pipeline_mode<synchronous>, transform_indices = @transform_5, window_bounds = array<i64: 1, 512>}, {transform_indices = @transform_6, window_bounds = array<i64: 1, 8, 128>}, {pipeline_mode = #tpu.pipeline_mode<synchronous>, transform_indices = @transform_7, window_bounds = array<i64: 8, 128>}, {pipeline_mode = #tpu.pipeline_mode<synchronous>, transform_indices = @transform_8, window_bounds = array<i64: 8, 128>}]} {
    %c0_i32 = arith.constant 0 : i32
    %0 = arith.cmpi eq, %arg0, %c0_i32 : i32
    %1 = arith.extui %0 : i1 to i32
    %c0_i32_0 = arith.constant 0 : i32
    %2 = arith.cmpi ne, %1, %c0_i32_0 : i32
    scf.if %2 {
      %c0_29 = arith.constant 0 : index
      %c0_30 = arith.constant 0 : index
      %45 = vector.load %arg1[%c0_29, %c0_30] : memref<8x128xf32, #tpu.memory_space<vmem>>, vector<8x128xf32>
      %c0_31 = arith.constant 0 : index
      %c0_32 = arith.constant 0 : index
      %46 = vector.load %arg10[%c0_31, %c0_32] : memref<8x128xf32, #tpu.memory_space<vmem>>, vector<8x128xf32>
      tpu.vector_store %arg10[%c0_31, %c0_32], %45 {strides = array<i32>} : memref<8x128xf32, #tpu.memory_space<vmem>>, vector<8x128xf32>,
      %c0_33 = arith.constant 0 : index
      %c0_34 = arith.constant 0 : index
      %47 = vector.load %arg2[%c0_33, %c0_34] : memref<8x128xf32, #tpu.memory_space<vmem>>, vector<8x128xf32>
      %c0_35 = arith.constant 0 : index
      %c0_36 = arith.constant 0 : index
      %48 = vector.load %arg11[%c0_35, %c0_36] : memref<8x128xf32, #tpu.memory_space<vmem>>, vector<8x128xf32>
      tpu.vector_store %arg11[%c0_35, %c0_36], %47 {strides = array<i32>} : memref<8x128xf32, #tpu.memory_space<vmem>>, vector<8x128xf32>,
    } else {
    }
    %c0 = arith.constant 0 : index
    %c0_1 = arith.constant 0 : index
    %c0_2 = arith.constant 0 : index
    %3 = vector.load %arg3[%c0, %c0_1, %c0_2] : memref<1x8x512xf32, #tpu.memory_space<vmem>>, vector<1x8x512xf32>
    %4 = vector.shape_cast %3 : vector<1x8x512xf32> to vector<8x512xf32>
    %c0_3 = arith.constant 0 : index
    %c0_4 = arith.constant 0 : index
    %5 = vector.load %arg4[%c0_3, %c0_4] : memref<512x512xf32, #tpu.memory_space<vmem>>, vector<512x512xf32>
    %cst = arith.constant dense<0.000000e+00> : vector<8x512xf32>
    %6 = tpu.matmul %4, %5, %cst {dimension_numbers = #tpu.dot_dimension_numbers<[1], [0], [0], [1], [0, 0, 1, 1], [], []>} : vector<8x512xf32>, vector<512x512xf32>, vector<8x512xf32> -> vector<8x512xf32>
    %c0_5 = arith.constant 0 : index
    %c0_6 = arith.constant 0 : index
    %7 = vector.load %arg6[%c0_5, %c0_6] : memref<1x512xf32, #tpu.memory_space<vmem>>, vector<1x512xf32>
    %8 = vector.broadcast %7 : vector<1x512xf32> to vector<8x512xf32>
    %9 = arith.addf %6, %8 : vector<8x512xf32>
    %10 = vector.shape_cast %9 : vector<8x512xf32> to vector<1x8x512xf32>
    %c0_7 = arith.constant 0 : index
    %c0_8 = arith.constant 0 : index
    %c0_9 = arith.constant 0 : index
    %11 = vector.load %arg12[%c0_7, %c0_8, %c0_9] : memref<1x8x512xf32, #tpu.memory_space<vmem>>, vector<1x8x512xf32>
    tpu.vector_store %arg12[%c0_7, %c0_8, %c0_9], %10 {strides = array<i32>} : memref<1x8x512xf32, #tpu.memory_space<vmem>>, vector<1x8x512xf32>,
    %c0_10 = arith.constant 0 : index
    %c0_11 = arith.constant 0 : index
    %12 = vector.load %arg5[%c0_10, %c0_11] : memref<128x512xf32, #tpu.memory_space<vmem>>, vector<128x512xf32>
    %c0_12 = arith.constant 0 : index
    %c0_13 = arith.constant 0 : index
    %13 = vector.load %arg10[%c0_12, %c0_13] : memref<8x128xf32, #tpu.memory_space<vmem>>, vector<8x128xf32>
    %c0_14 = arith.constant 0 : index
    %c0_15 = arith.constant 0 : index
    %14 = vector.load %arg11[%c0_14, %c0_15] : memref<8x128xf32, #tpu.memory_space<vmem>>, vector<8x128xf32>
    %c0_i32_16 = arith.constant 0 : i32
    %15 = arith.index_cast %c0_i32_16 : i32 to index
    %c0_17 = arith.constant 0 : index
    %c0_18 = arith.constant 0 : index
    %16 = vector.load %arg12[%15, %c0_17, %c0_18] : memref<1x8x512xf32, #tpu.memory_space<vmem>>, vector<1x8x512xf32>
    %17 = vector.shape_cast %16 : vector<1x8x512xf32> to vector<8x512xf32>
    %cst_19 = arith.constant dense<0.000000e+00> : vector<8x512xf32>
    %18 = tpu.matmul %13, %12, %cst_19 {dimension_numbers = #tpu.dot_dimension_numbers<[1], [0], [0], [1], [0, 0, 1, 1], [], []>} : vector<8x128xf32>, vector<128x512xf32>, vector<8x512xf32> -> vector<8x512xf32>
    %19 = arith.addf %17, %18 : vector<8x512xf32>
    %20 = vector.extract_strided_slice %19 {offsets = [0, 0], sizes = [8, 384], strides = [1, 1]} : vector<8x512xf32> to vector<8x384xf32>
    %21 = arith.negf %20 : vector<8x384xf32>
    %22 = math.exp %21 : vector<8x384xf32>
    %cst_20 = arith.constant 1.000000e+00 : f32
    %23 = vector.broadcast %cst_20 : f32 to vector<8x384xf32>
    %24 = arith.addf %23, %22 : vector<8x384xf32>
    %25 = arith.divf %23, %24 : vector<8x384xf32>
    %26 = vector.extract_strided_slice %25 {offsets = [0, 0], sizes = [8, 128], strides = [1, 1]} : vector<8x384xf32> to vector<8x128xf32>
    %27 = vector.extract_strided_slice %25 {offsets = [0, 128], sizes = [8, 128], strides = [1, 1]} : vector<8x384xf32> to vector<8x128xf32>
    %28 = vector.extract_strided_slice %25 {offsets = [0, 256], sizes = [8, 128], strides = [1, 1]} : vector<8x384xf32> to vector<8x128xf32>
    %29 = vector.extract_strided_slice %19 {offsets = [0, 384], sizes = [8, 128], strides = [1, 1]} : vector<8x512xf32> to vector<8x128xf32>
    %30 = math.tanh %29 : vector<8x128xf32>
    %31 = arith.mulf %27, %14 : vector<8x128xf32>
    %32 = arith.mulf %26, %30 : vector<8x128xf32>
    %33 = arith.addf %31, %32 : vector<8x128xf32>
    %34 = math.tanh %33 : vector<8x128xf32>
    %35 = arith.mulf %28, %34 : vector<8x128xf32>
    %36 = arith.index_cast %c0_i32_16 : i32 to index
    %c0_21 = arith.constant 0 : index
    %c0_22 = arith.constant 0 : index
    %37 = vector.load %arg7[%36, %c0_21, %c0_22] : memref<1x8x128xf32, #tpu.memory_space<vmem>>, vector<1x8x128xf32>
    %38 = vector.shape_cast %37 : vector<1x8x128xf32> to vector<8x128xf32>
    %39 = vector.shape_cast %35 : vector<8x128xf32> to vector<1x8x128xf32>
    tpu.vector_store %arg7[%36, %c0_21, %c0_22], %39 {strides = array<i32>} : memref<1x8x128xf32, #tpu.memory_space<vmem>>, vector<1x8x128xf32>,
    %c1_i32 = arith.constant 1 : i32
    %c0_23 = arith.constant 0 : index
    %c0_24 = arith.constant 0 : index
    %40 = vector.load %arg10[%c0_23, %c0_24] : memref<8x128xf32, #tpu.memory_space<vmem>>, vector<8x128xf32>
    tpu.vector_store %arg10[%c0_23, %c0_24], %35 {strides = array<i32>} : memref<8x128xf32, #tpu.memory_space<vmem>>, vector<8x128xf32>,
    %c0_25 = arith.constant 0 : index
    %c0_26 = arith.constant 0 : index
    %41 = vector.load %arg11[%c0_25, %c0_26] : memref<8x128xf32, #tpu.memory_space<vmem>>, vector<8x128xf32>
    tpu.vector_store %arg11[%c0_25, %c0_26], %33 {strides = array<i32>} : memref<8x128xf32, #tpu.memory_space<vmem>>, vector<8x128xf32>,
    %c0_i32_27 = arith.constant 0 : i32
    %42 = arith.cmpi eq, %arg0, %c0_i32_27 : i32
    %43 = arith.extui %42 : i1 to i32
    %c0_i32_28 = arith.constant 0 : i32
    %44 = arith.cmpi ne, %43, %c0_i32_28 : i32
    scf.if %44 {
      %c0_29 = arith.constant 0 : index
      %c0_30 = arith.constant 0 : index
      %45 = vector.load %arg8[%c0_29, %c0_30] : memref<8x128xf32, #tpu.memory_space<vmem>>, vector<8x128xf32>
      tpu.vector_store %arg8[%c0_29, %c0_30], %35 {strides = array<i32>} : memref<8x128xf32, #tpu.memory_space<vmem>>, vector<8x128xf32>,
      %c0_31 = arith.constant 0 : index
      %c0_32 = arith.constant 0 : index
      %46 = vector.load %arg9[%c0_31, %c0_32] : memref<8x128xf32, #tpu.memory_space<vmem>>, vector<8x128xf32>
      tpu.vector_store %arg9[%c0_31, %c0_32], %33 {strides = array<i32>} : memref<8x128xf32, #tpu.memory_space<vmem>>, vector<8x128xf32>,
    } else {
    }
    return
  }
  func.func @transform_0(%arg0: i32) -> (i32, i32) {
    %c0_i32 = arith.constant 0 : i32
    %c0_i32_0 = arith.constant 0 : i32
    %c0_i32_1 = arith.constant 0 : i32
    return %c0_i32, %c0_i32_0 : i32, i32
  }
  func.func @transform_1(%arg0: i32) -> (i32, i32) {
    %c0_i32 = arith.constant 0 : i32
    %c0_i32_0 = arith.constant 0 : i32
    %c0_i32_1 = arith.constant 0 : i32
    return %c0_i32, %c0_i32_0 : i32, i32
  }
  func.func @transform_2(%arg0: i32) -> (i32, i32, i32) {
    %c0_i32 = arith.constant 0 : i32
    %c0_i32_0 = arith.constant 0 : i32
    %c0_i32_1 = arith.constant 0 : i32
    return %arg0, %c0_i32, %c0_i32_0 : i32, i32, i32
  }
  func.func @transform_3(%arg0: i32) -> (i32, i32) {
    %c0_i32 = arith.constant 0 : i32
    %c0_i32_0 = arith.constant 0 : i32
    %c0_i32_1 = arith.constant 0 : i32
    return %c0_i32, %c0_i32_0 : i32, i32
  }
  func.func @transform_4(%arg0: i32) -> (i32, i32) {
    %c0_i32 = arith.constant 0 : i32
    %c0_i32_0 = arith.constant 0 : i32
    %c0_i32_1 = arith.constant 0 : i32
    return %c0_i32, %c0_i32_0 : i32, i32
  }
  func.func @transform_5(%arg0: i32) -> (i32, i32) {
    %c0_i32 = arith.constant 0 : i32
    %c0_i32_0 = arith.constant 0 : i32
    %c0_i32_1 = arith.constant 0 : i32
    return %c0_i32, %c0_i32_0 : i32, i32
  }
  func.func @transform_6(%arg0: i32) -> (i32, i32, i32) {
    %c0_i32 = arith.constant 0 : i32
    %c0_i32_0 = arith.constant 0 : i32
    %c0_i32_1 = arith.constant 0 : i32
    return %arg0, %c0_i32, %c0_i32_0 : i32, i32, i32
  }
  func.func @transform_7(%arg0: i32) -> (i32, i32) {
    %c0_i32 = arith.constant 0 : i32
    %c0_i32_0 = arith.constant 0 : i32
    %c0_i32_1 = arith.constant 0 : i32
    return %c0_i32, %c0_i32_0 : i32, i32
  }
  func.func @transform_8(%arg0: i32) -> (i32, i32) {
    %c0_i32 = arith.constant 0 : i32
    %c0_i32_0 = arith.constant 0 : i32
    %c0_i32_1 = arith.constant 0 : i32
    return %c0_i32, %c0_i32_0 : i32, i32
  }
}

</mosaic_0001>

<bundles_post_ra>
// kernel: tpu_custom_call.1
= control target key start
LH: loop header
LB: loop body
LE: loop exit
PB: predicated region body
PF: predicated region fallthrough
CT: control target
= control target key end

     0   :  { %14 = vsyncpa [#allocation6], 0  ;;  %s1265_s0 = inlined_call_operand.hbm [shape: f32[8,128], index: 0, kind: input, shape index: {}]   ;;  %s1266_s1 = inlined_call_operand.hbm [shape: f32[8,128], index: 1, kind: input, shape index: {}]   ;;  %s1267_s2 = inlined_call_operand.hbm [shape: f32[1,8,512], index: 2, kind: input, shape index: {}]   ;;  %s1268_s3 = inlined_call_operand.hbm [shape: f32[512,512], index: 3, kind: input, shape index: {}]   ;;  %s1269_s4 = inlined_call_operand.hbm [shape: f32[128,512], index: 4, kind: input, shape index: {}]   ;;  %s1270_s5 = inlined_call_operand.vmem [shape: f32[1,512], index: 5, kind: input, shape index: {}]   ;;  %s1271_s6 = inlined_call_operand.hbm [shape: f32[1,8,128], index: 6, kind: output, shape index: {0}]   ;;  %s1272_s7 = inlined_call_operand.hbm [shape: f32[8,128], index: 7, kind: output, shape index: {1}]   ;;  %s1273_s8 = inlined_call_operand.hbm [shape: f32[8,128], index: 8, kind: output, shape index: {2}]  }
   0x1   :  { %15 = vsyncpa [#allocation9], 0 }
   0x2   :  { %16 = vsyncpa [#allocation12], 0 }
   0x3   :  { %17 = vsyncpa [#allocation7], 0 }
   0x4   :  { %18 = vsyncpa [#allocation16], 0  ;;  %s1160_s27 = smov [#allocation8]   ;;  %s1161_s29 = smov [#allocation11]  }
   0x5   :  { %s35_s28 = sshll.u32 %s1160_s27, 4  ;;  %s54_s30 = sshll.u32 %s1161_s29, 4  ;;  %s36_s28 = int_to_ptr.vmem [resolvable:$true] %s35_s28  ;;  %s55_s30 = int_to_ptr.vmem [resolvable:$true] %s54_s30 }
   0x6   :  { %s998_s9 = scalar_lea.vmem %s36_s28, 128  ;;  %p1003_p1 = scmp.lt.s32.totalorder %s36_s28, %s36_s28 }
   0x7   :  { %p999_p0 = scmp.ne.s32.totalorder %s36_s28, %s998_s9  ;;  %p1004_p2 = scmp.lt.s32.totalorder %s998_s9, %s998_s9 }
   0x9   :  { %p1005_p3 = por %p1004_p2, %p1003_p1 }
   0xb   :  { %p1006_p4 = pnand %p1005_p3, %p999_p0 }
   0xd   :  { %1009 = shalt.err (!%p1006_p4)
}
   0xe   :  { %38 = dma.hbm_to_vmem [thread:$0]  %s1266_s1, 128, %s36_s28, [#allocation9]  }
   0xf   :  { %s1018_s12 = scalar_lea.vmem %s55_s30, 32768  ;;  %p1023_p6 = scmp.lt.s32.totalorder %s55_s30, %s55_s30 }
  0x10   :  { %p1019_p5 = scmp.ne.s32.totalorder %s55_s30, %s1018_s12  ;;  %p1024_p7 = scmp.lt.s32.totalorder %s1018_s12, %s1018_s12 }
  0x12   :  { %p1025_p8 = por %p1024_p7, %p1023_p6 }
  0x14   :  { %p1026_p9 = pnand %p1025_p8, %p1019_p5 }
  0x16   :  { %1029 = shalt.err (!%p1026_p9)
}
  0x17   :  { %s1162_s13 = smov 512   ;;  %s1163_s14 = smov 32  }
  0x18   :  { %60 = dma.hbm_to_vmem [thread:$0]  %s1268_s3, 32768, %s55_s30, [#allocation12], %s1162_s13, %s1162_s13, %s1163_s14  }
  0x19   :  { %s1164_s17 = smov [#allocation5]   ;;  %s1165_s19 = smov [#allocation10]  }
  0x1a   :  { %s25_s18 = sshll.u32 %s1164_s17, 4  ;;  %s45_s1 = sshll.u32 %s1165_s19, 4  ;;  %s26_s18 = int_to_ptr.vmem [resolvable:$true] %s25_s18  ;;  %s46_s1 = int_to_ptr.vmem [resolvable:$true] %s45_s1 }
  0x1b   :  { %s1038_s20 = scalar_lea.vmem %s26_s18, 128  ;;  %p1043_p11 = scmp.lt.s32.totalorder %s26_s18, %s26_s18 }
  0x1c   :  { %p1039_p10 = scmp.ne.s32.totalorder %s26_s18, %s1038_s20  ;;  %p1044_p12 = scmp.lt.s32.totalorder %s1038_s20, %s1038_s20 }
  0x1e   :  { %p1045_p13 = por %p1044_p12, %p1043_p11 }
  0x20   :  { %p1046_p0 = pnand %p1045_p13, %p1039_p10 }
  0x22   :  { %1049 = shalt.err (!%p1046_p0)
}
  0x23   :  { %28 = dma.hbm_to_vmem [thread:$0]  %s1265_s0, 128, %s26_s18, [#allocation6]  }
  0x24   :  { %s1058_s23 = scalar_lea.vmem %s46_s1, 512  ;;  %p1063_p2 = scmp.lt.s32.totalorder %s46_s1, %s46_s1 }
  0x25   :  { %p1059_p1 = scmp.ne.s32.totalorder %s46_s1, %s1058_s23  ;;  %p1064_p3 = scmp.lt.s32.totalorder %s1058_s23, %s1058_s23 }
  0x27   :  { %p1065_p4 = por %p1064_p3, %p1063_p2 }
  0x29   :  { %p1066_p5 = pnand %p1065_p4, %p1059_p1 }
  0x2b   :  { %1069 = shalt.err (!%p1066_p5)
}
  0x2c   :  { %48 = dma.hbm_to_vmem [thread:$0]  %s1267_s2, 512, %s46_s1, [#allocation9]  }
  0x2d   :  { %s1166_s25 = smov [#allocation13]  }
  0x2e   :  { %s66_s26 = sshll.u32 %s1166_s25, 4  ;;  %s67_s26 = int_to_ptr.vmem [resolvable:$true] %s66_s26 }
  0x2f   :  { %s1078_s27 = scalar_lea.vmem %s67_s26, 8192  ;;  %p1083_p7 = scmp.lt.s32.totalorder %s67_s26, %s67_s26 }
  0x30   :  { %p1079_p6 = scmp.ne.s32.totalorder %s67_s26, %s1078_s27  ;;  %p1084_p8 = scmp.lt.s32.totalorder %s1078_s27, %s1078_s27 }
  0x32   :  { %p1085_p9 = por %p1084_p8, %p1083_p7 }
  0x34   :  { %p1086_p10 = pnand %p1085_p9, %p1079_p6 }
  0x36   :  { %1089 = shalt.err (!%p1086_p10)
}
  0x37   :  { %72 = dma.hbm_to_vmem [thread:$0]  %s1269_s4, 8192, %s67_s26, [#allocation12], %s1162_s13, %s1162_s13, %s1163_s14  }
  0x38   :  { %1150 = dma.done.wait [#allocation6], 128  }
  0x39   :  { %1151 = vsyncadd [#allocation6], 4294967168 }
  0x3a   :  { %1152 = dma.done.wait [#allocation9], 640  }
  0x3b   :  { %1153 = vsyncadd [#allocation9], 4294966656 }
  0x3c   :  { %1154 = dma.done.wait [#allocation12], 40960  }
  0x3d   :  { %1155 = vsyncadd [#allocation12], 4294926336  ;;  %v163_v0 = vld [vmem:[#allocation11 + $0x1e8] sm:$0xff]  ;;  %v162_v2 = vld [vmem:[#allocation11 + $0x1e0] sm:$0xff]  ;;  %s1169_s30 = smov [#allocation14]   ;;  %s1170_s10 = smov [#allocation17]  }
  0x3e   :  { %v291_v1 = vld [vmem:[#allocation11 + $0x5e8] sm:$0xff]  ;;  %380 = vmatprep.subr.mxu0 %v163_v0  ;;  %v290_v3 = vld [vmem:[#allocation11 + $0x5e0] sm:$0xff]  ;;  %s922_s9 = sshll.u32 %s1169_s30, 4  ;;  %s942_s11 = sshll.u32 %s1170_s10, 4  ;;  %s923_s9 = int_to_ptr.vmem [resolvable:$true] %s922_s9  ;;  %s943_s11 = int_to_ptr.vmem [resolvable:$true] %s942_s11 }
  0x3f   :  { %451 = vmatprep.subr.mxu1 %v291_v1  ;;  %v159_v4 = vld [vmem:[#allocation11 + $0x1c8] sm:$0xff]  ;;  %381 = vmatpush1.msra.mxu0 %v162_v2  ;;  %v158_v6 = vld [vmem:[#allocation11 + $0x1c0] sm:$0xff] }
  0x40   :  { %v287_v5 = vld [vmem:[#allocation11 + $0x5c8] sm:$0xff]  ;;  %452 = vmatpush1.msra.mxu1 %v290_v3  ;;  %v286_v7 = vld [vmem:[#allocation11 + $0x5c0] sm:$0xff]  ;;  %382 = vmatprep.subr.mxu0 %v159_v4 }
  0x41   :  { %v155_v8 = vld [vmem:[#allocation11 + $0x1a8] sm:$0xff]  ;;  %453 = vmatprep.subr.mxu1 %v287_v5  ;;  %v154_v10 = vld [vmem:[#allocation11 + $0x1a0] sm:$0xff]  ;;  %383 = vmatpush1.msra.mxu0 %v158_v6 }
  0x42   :  { %v283_v9 = vld [vmem:[#allocation11 + $0x5a8] sm:$0xff]  ;;  %v282_v11 = vld [vmem:[#allocation11 + $0x5a0] sm:$0xff]  ;;  %454 = vmatpush1.msra.mxu1 %v286_v7  ;;  %384 = vmatprep.subr.mxu0 %v155_v8 }
  0x43   :  { %v151_v12 = vld [vmem:[#allocation11 + $0x188] sm:$0xff]  ;;  %455 = vmatprep.subr.mxu1 %v283_v9  ;;  %v150_v14 = vld [vmem:[#allocation11 + $0x180] sm:$0xff]  ;;  %385 = vmatpush1.msra.mxu0 %v154_v10 }
  0x44   :  { %v279_v13 = vld [vmem:[#allocation11 + $0x588] sm:$0xff]  ;;  %v278_v15 = vld [vmem:[#allocation11 + $0x580] sm:$0xff]  ;;  %456 = vmatpush1.msra.mxu1 %v282_v11  ;;  %386 = vmatprep.subr.mxu0 %v151_v12 }
  0x45   :  { %v147_v16 = vld [vmem:[#allocation11 + $0x168] sm:$0xff]  ;;  %457 = vmatprep.subr.mxu1 %v279_v13  ;;  %v146_v18 = vld [vmem:[#allocation11 + $0x160] sm:$0xff]  ;;  %387 = vmatpush1.msra.mxu0 %v150_v14 }
  0x46   :  { %v275_v17 = vld [vmem:[#allocation11 + $0x568] sm:$0xff]  ;;  %v274_v19 = vld [vmem:[#allocation11 + $0x560] sm:$0xff]  ;;  %458 = vmatpush1.msra.mxu1 %v278_v15  ;;  %388 = vmatprep.subr.mxu0 %v147_v16 }
  0x47   :  { %v143_v20 = vld [vmem:[#allocation11 + $0x148] sm:$0xff]  ;;  %459 = vmatprep.subr.mxu1 %v275_v17  ;;  %v142_v22 = vld [vmem:[#allocation11 + $0x140] sm:$0xff]  ;;  %389 = vmatpush1.msra.mxu0 %v146_v18 }
  0x48   :  { %v271_v21 = vld [vmem:[#allocation11 + $0x548] sm:$0xff]  ;;  %v270_v23 = vld [vmem:[#allocation11 + $0x540] sm:$0xff]  ;;  %460 = vmatpush1.msra.mxu1 %v274_v19  ;;  %390 = vmatprep.subr.mxu0 %v143_v20 }
  0x49   :  { %v139_v24 = vld [vmem:[#allocation11 + $0x128] sm:$0xff]  ;;  %461 = vmatprep.subr.mxu1 %v271_v21  ;;  %v138_v26 = vld [vmem:[#allocation11 + $0x120] sm:$0xff]  ;;  %391 = vmatpush1.msra.mxu0 %v142_v22 }
  0x4a   :  { %v267_v25 = vld [vmem:[#allocation11 + $0x528] sm:$0xff]  ;;  %v266_v27 = vld [vmem:[#allocation11 + $0x520] sm:$0xff]  ;;  %462 = vmatpush1.msra.mxu1 %v270_v23  ;;  %392 = vmatprep.subr.mxu0 %v139_v24 }
  0x4b   :  { %v135_v28 = vld [vmem:[#allocation11 + $0x108] sm:$0xff]  ;;  %463 = vmatprep.subr.mxu1 %v267_v25  ;;  %v134_v30 = vld [vmem:[#allocation11 + $0x100] sm:$0xff]  ;;  %393 = vmatpush1.msra.mxu0 %v138_v26 }
  0x4c   :  { %v263_v29 = vld [vmem:[#allocation11 + $0x508] sm:$0xff]  ;;  %v262_v31 = vld [vmem:[#allocation11 + $0x500] sm:$0xff]  ;;  %464 = vmatpush1.msra.mxu1 %v266_v27  ;;  %394 = vmatprep.subr.mxu0 %v135_v28 }
  0x4d   :  { %v131_v32 = vld [vmem:[#allocation11 + $0xe8] sm:$0xff]  ;;  %465 = vmatprep.subr.mxu1 %v263_v29  ;;  %v130_v34 = vld [vmem:[#allocation11 + $0xe0] sm:$0xff]  ;;  %395 = vmatpush1.msra.mxu0 %v134_v30 }
  0x4e   :  { %v259_v33 = vld [vmem:[#allocation11 + $0x4e8] sm:$0xff]  ;;  %v258_v35 = vld [vmem:[#allocation11 + $0x4e0] sm:$0xff]  ;;  %466 = vmatpush1.msra.mxu1 %v262_v31  ;;  %396 = vmatprep.subr.mxu0 %v131_v32 }
  0x4f   :  { %v127_v36 = vld [vmem:[#allocation11 + $0xc8] sm:$0xff]  ;;  %467 = vmatprep.subr.mxu1 %v259_v33  ;;  %v126_v38 = vld [vmem:[#allocation11 + $0xc0] sm:$0xff]  ;;  %397 = vmatpush1.msra.mxu0 %v130_v34 }
  0x50   :  { %v255_v37 = vld [vmem:[#allocation11 + $0x4c8] sm:$0xff]  ;;  %v254_v39 = vld [vmem:[#allocation11 + $0x4c0] sm:$0xff]  ;;  %468 = vmatpush1.msra.mxu1 %v258_v35  ;;  %398 = vmatprep.subr.mxu0 %v127_v36 }
  0x51   :  { %v123_v40 = vld [vmem:[#allocation11 + $0xa8] sm:$0xff]  ;;  %469 = vmatprep.subr.mxu1 %v255_v37  ;;  %v122_v42 = vld [vmem:[#allocation11 + $0xa0] sm:$0xff]  ;;  %399 = vmatpush1.msra.mxu0 %v126_v38 }
  0x52   :  { %v251_v41 = vld [vmem:[#allocation11 + $0x4a8] sm:$0xff]  ;;  %v250_v43 = vld [vmem:[#allocation11 + $0x4a0] sm:$0xff]  ;;  %470 = vmatpush1.msra.mxu1 %v254_v39  ;;  %400 = vmatprep.subr.mxu0 %v123_v40 }
  0x53   :  { %v119_v44 = vld [vmem:[#allocation11 + $0x88] sm:$0xff]  ;;  %471 = vmatprep.subr.mxu1 %v251_v41  ;;  %v118_v46 = vld [vmem:[#allocation11 + $0x80] sm:$0xff]  ;;  %401 = vmatpush1.msra.mxu0 %v122_v42 }
  0x54   :  { %v247_v45 = vld [vmem:[#allocation11 + $0x488] sm:$0xff]  ;;  %v246_v47 = vld [vmem:[#allocation11 + $0x480] sm:$0xff]  ;;  %472 = vmatpush1.msra.mxu1 %v250_v43  ;;  %402 = vmatprep.subr.mxu0 %v119_v44 }
  0x55   :  { %v115_v48 = vld [vmem:[#allocation11 + $0x68] sm:$0xff]  ;;  %473 = vmatprep.subr.mxu1 %v247_v45  ;;  %v114_v50 = vld [vmem:[#allocation11 + $0x60] sm:$0xff]  ;;  %403 = vmatpush1.msra.mxu0 %v118_v46 }
  0x56   :  { %v243_v49 = vld [vmem:[#allocation11 + $0x468] sm:$0xff]  ;;  %v242_v51 = vld [vmem:[#allocation11 + $0x460] sm:$0xff]  ;;  %474 = vmatpush1.msra.mxu1 %v246_v47  ;;  %404 = vmatprep.subr.mxu0 %v115_v48 }
  0x57   :  { %v111_v52 = vld [vmem:[#allocation11 + $0x48] sm:$0xff]  ;;  %475 = vmatprep.subr.mxu1 %v243_v49  ;;  %v110_v54 = vld [vmem:[#allocation11 + $0x40] sm:$0xff]  ;;  %405 = vmatpush1.msra.mxu0 %v114_v50 }
  0x58   :  { %v239_v53 = vld [vmem:[#allocation11 + $0x448] sm:$0xff]  ;;  %v238_v55 = vld [vmem:[#allocation11 + $0x440] sm:$0xff]  ;;  %476 = vmatpush1.msra.mxu1 %v242_v51  ;;  %406 = vmatprep.subr.mxu0 %v111_v52 }
  0x59   :  { %v107_v56 = vld [vmem:[#allocation11 + $0x28] sm:$0xff]  ;;  %477 = vmatprep.subr.mxu1 %v239_v53  ;;  %v106_v58 = vld [vmem:[#allocation11 + $0x20] sm:$0xff]  ;;  %407 = vmatpush1.msra.mxu0 %v110_v54 }
  0x5a   :  { %v235_v57 = vld [vmem:[#allocation11 + $0x428] sm:$0xff]  ;;  %v234_v59 = vld [vmem:[#allocation11 + $0x420] sm:$0xff]  ;;  %478 = vmatpush1.msra.mxu1 %v238_v55  ;;  %408 = vmatprep.subr.mxu0 %v107_v56 }
  0x5b   :  { %v103_v60 = vld [vmem:[#allocation11 + $0x8] sm:$0xff]  ;;  %479 = vmatprep.subr.mxu1 %v235_v57  ;;  %v102_v62 = vld [vmem:[#allocation11] sm:$0xff]  ;;  %409 = vmatpush1.msra.mxu0 %v106_v58 }
  0x5c   :  { %v231_v61 = vld [vmem:[#allocation11 + $0x408] sm:$0xff]  ;;  %v230_v63 = vld [vmem:[#allocation11 + $0x400] sm:$0xff]  ;;  %480 = vmatpush1.msra.mxu1 %v234_v59  ;;  %410 = vmatprep.subr.mxu0 %v103_v60 }
  0x5d   :  { %v227_v0 = vld [vmem:[#allocation11 + $0x3e8] sm:$0xff]  ;;  %481 = vmatprep.subr.mxu1 %v231_v61  ;;  %v226_v2 = vld [vmem:[#allocation11 + $0x3e0] sm:$0xff]  ;;  %411 = vmatpush1.msra.mxu0 %v102_v62 }
  0x5e   :  { %v355_v1 = vld [vmem:[#allocation11 + $0x7e8] sm:$0xff]  ;;  %v354_v3 = vld [vmem:[#allocation11 + $0x7e0] sm:$0xff]  ;;  %482 = vmatpush1.msra.mxu1 %v230_v63  ;;  %412 = vmatprep.subr.mxu0 %v227_v0 }
  0x5f   :  { %v223_v4 = vld [vmem:[#allocation11 + $0x3c8] sm:$0xff]  ;;  %483 = vmatprep.subr.mxu1 %v355_v1  ;;  %v222_v6 = vld [vmem:[#allocation11 + $0x3c0] sm:$0xff]  ;;  %413 = vmatpush2.msra.mxu0 %v226_v2  ;;  %v1241_v2 = vld [vmem:[#allocation10 + $0x18] sm:$0xff] }
  0x60   :  { %v351_v5 = vld [vmem:[#allocation11 + $0x7c8] sm:$0xff]  ;;  %v350_v7 = vld [vmem:[#allocation11 + $0x7c0] sm:$0xff]  ;;  %484 = vmatpush2.msra.mxu1 %v354_v3  ;;  %414 = vmatprep.subr.mxu0 %v223_v4  ;;  %v165_v3 = vld [vmem:[#allocation11 + $0x1f8] sm:$0xff] }
  0x61   :  { %v219_v8 = vld [vmem:[#allocation11 + $0x3a8] sm:$0xff]  ;;  %485 = vmatprep.subr.mxu1 %v351_v5  ;;  %v218_v10 = vld [vmem:[#allocation11 + $0x3a0] sm:$0xff]  ;;  %415 = vmatpush2.msra.mxu0 %v222_v6  ;;  %v293_v4 = vld [vmem:[#allocation11 + $0x5f8] sm:$0xff] }
  0x62   :  { %v347_v9 = vld [vmem:[#allocation11 + $0x7a8] sm:$0xff]  ;;  %v346_v11 = vld [vmem:[#allocation11 + $0x7a0] sm:$0xff]  ;;  %486 = vmatpush2.msra.mxu1 %v350_v7  ;;  %416 = vmatprep.subr.mxu0 %v219_v8  ;;  %v1244_v5 = vld [vmem:[#allocation10 + $0x10] sm:$0xff] }
  0x63   :  { %v215_v12 = vld [vmem:[#allocation11 + $0x388] sm:$0xff]  ;;  %487 = vmatprep.subr.mxu1 %v347_v9  ;;  %v214_v14 = vld [vmem:[#allocation11 + $0x380] sm:$0xff]  ;;  %417 = vmatpush2.msra.mxu0 %v218_v10  ;;  %v164_v6 = vld [vmem:[#allocation11 + $0x1f0] sm:$0xff] }
  0x64   :  { %v343_v13 = vld [vmem:[#allocation11 + $0x788] sm:$0xff]  ;;  %v342_v15 = vld [vmem:[#allocation11 + $0x780] sm:$0xff]  ;;  %488 = vmatpush2.msra.mxu1 %v346_v11  ;;  %418 = vmatprep.subr.mxu0 %v215_v12  ;;  %v292_v7 = vld [vmem:[#allocation11 + $0x5f0] sm:$0xff] }
  0x65   :  { %v211_v16 = vld [vmem:[#allocation11 + $0x368] sm:$0xff]  ;;  %489 = vmatprep.subr.mxu1 %v343_v13  ;;  %v210_v18 = vld [vmem:[#allocation11 + $0x360] sm:$0xff]  ;;  %419 = vmatpush2.msra.mxu0 %v214_v14  ;;  %v161_v8 = vld [vmem:[#allocation11 + $0x1d8] sm:$0xff] }
  0x66   :  { %v339_v17 = vld [vmem:[#allocation11 + $0x768] sm:$0xff]  ;;  %v338_v19 = vld [vmem:[#allocation11 + $0x760] sm:$0xff]  ;;  %490 = vmatpush2.msra.mxu1 %v342_v15  ;;  %420 = vmatprep.subr.mxu0 %v211_v16  ;;  %v289_v9 = vld [vmem:[#allocation11 + $0x5d8] sm:$0xff] }
  0x67   :  { %v207_v20 = vld [vmem:[#allocation11 + $0x348] sm:$0xff]  ;;  %491 = vmatprep.subr.mxu1 %v339_v17  ;;  %v206_v22 = vld [vmem:[#allocation11 + $0x340] sm:$0xff]  ;;  %421 = vmatpush2.msra.mxu0 %v210_v18  ;;  %v160_v10 = vld [vmem:[#allocation11 + $0x1d0] sm:$0xff] }
  0x68   :  { %v335_v21 = vld [vmem:[#allocation11 + $0x748] sm:$0xff]  ;;  %v334_v23 = vld [vmem:[#allocation11 + $0x740] sm:$0xff]  ;;  %492 = vmatpush2.msra.mxu1 %v338_v19  ;;  %422 = vmatprep.subr.mxu0 %v207_v20  ;;  %v288_v11 = vld [vmem:[#allocation11 + $0x5d0] sm:$0xff] }
  0x69   :  { %v203_v24 = vld [vmem:[#allocation11 + $0x328] sm:$0xff]  ;;  %493 = vmatprep.subr.mxu1 %v335_v21  ;;  %v202_v26 = vld [vmem:[#allocation11 + $0x320] sm:$0xff]  ;;  %423 = vmatpush2.msra.mxu0 %v206_v22  ;;  %v157_v12 = vld [vmem:[#allocation11 + $0x1b8] sm:$0xff] }
  0x6a   :  { %v331_v25 = vld [vmem:[#allocation11 + $0x728] sm:$0xff]  ;;  %v330_v27 = vld [vmem:[#allocation11 + $0x720] sm:$0xff]  ;;  %494 = vmatpush2.msra.mxu1 %v334_v23  ;;  %424 = vmatprep.subr.mxu0 %v203_v24  ;;  %v285_v13 = vld [vmem:[#allocation11 + $0x5b8] sm:$0xff] }
  0x6b   :  { %v199_v28 = vld [vmem:[#allocation11 + $0x308] sm:$0xff]  ;;  %495 = vmatprep.subr.mxu1 %v331_v25  ;;  %v198_v30 = vld [vmem:[#allocation11 + $0x300] sm:$0xff]  ;;  %425 = vmatpush2.msra.mxu0 %v202_v26  ;;  %v156_v14 = vld [vmem:[#allocation11 + $0x1b0] sm:$0xff] }
  0x6c   :  { %v327_v29 = vld [vmem:[#allocation11 + $0x708] sm:$0xff]  ;;  %v326_v31 = vld [vmem:[#allocation11 + $0x700] sm:$0xff]  ;;  %496 = vmatpush2.msra.mxu1 %v330_v27  ;;  %426 = vmatprep.subr.mxu0 %v199_v28  ;;  %v284_v15 = vld [vmem:[#allocation11 + $0x5b0] sm:$0xff] }
  0x6d   :  { %v195_v32 = vld [vmem:[#allocation11 + $0x2e8] sm:$0xff]  ;;  %497 = vmatprep.subr.mxu1 %v327_v29  ;;  %v194_v34 = vld [vmem:[#allocation11 + $0x2e0] sm:$0xff]  ;;  %427 = vmatpush2.msra.mxu0 %v198_v30  ;;  %v153_v16 = vld [vmem:[#allocation11 + $0x198] sm:$0xff] }
  0x6e   :  { %v323_v33 = vld [vmem:[#allocation11 + $0x6e8] sm:$0xff]  ;;  %v322_v35 = vld [vmem:[#allocation11 + $0x6e0] sm:$0xff]  ;;  %498 = vmatpush2.msra.mxu1 %v326_v31  ;;  %428 = vmatprep.subr.mxu0 %v195_v32  ;;  %v281_v17 = vld [vmem:[#allocation11 + $0x598] sm:$0xff] }
  0x6f   :  { %v191_v36 = vld [vmem:[#allocation11 + $0x2c8] sm:$0xff]  ;;  %499 = vmatprep.subr.mxu1 %v323_v33  ;;  %v190_v38 = vld [vmem:[#allocation11 + $0x2c0] sm:$0xff]  ;;  %429 = vmatpush2.msra.mxu0 %v194_v34  ;;  %v152_v18 = vld [vmem:[#allocation11 + $0x190] sm:$0xff] }
  0x70   :  { %v319_v37 = vld [vmem:[#allocation11 + $0x6c8] sm:$0xff]  ;;  %v318_v39 = vld [vmem:[#allocation11 + $0x6c0] sm:$0xff]  ;;  %500 = vmatpush2.msra.mxu1 %v322_v35  ;;  %430 = vmatprep.subr.mxu0 %v191_v36  ;;  %v280_v19 = vld [vmem:[#allocation11 + $0x590] sm:$0xff] }
  0x71   :  { %v187_v40 = vld [vmem:[#allocation11 + $0x2a8] sm:$0xff]  ;;  %501 = vmatprep.subr.mxu1 %v319_v37  ;;  %v186_v42 = vld [vmem:[#allocation11 + $0x2a0] sm:$0xff]  ;;  %431 = vmatpush2.msra.mxu0 %v190_v38  ;;  %v149_v20 = vld [vmem:[#allocation11 + $0x178] sm:$0xff] }
  0x72   :  { %v315_v41 = vld [vmem:[#allocation11 + $0x6a8] sm:$0xff]  ;;  %v314_v43 = vld [vmem:[#allocation11 + $0x6a0] sm:$0xff]  ;;  %502 = vmatpush2.msra.mxu1 %v318_v39  ;;  %432 = vmatprep.subr.mxu0 %v187_v40  ;;  %v277_v21 = vld [vmem:[#allocation11 + $0x578] sm:$0xff] }
  0x73   :  { %v183_v44 = vld [vmem:[#allocation11 + $0x288] sm:$0xff]  ;;  %503 = vmatprep.subr.mxu1 %v315_v41  ;;  %v182_v46 = vld [vmem:[#allocation11 + $0x280] sm:$0xff]  ;;  %433 = vmatpush2.msra.mxu0 %v186_v42  ;;  %v148_v22 = vld [vmem:[#allocation11 + $0x170] sm:$0xff] }
  0x74   :  { %v311_v45 = vld [vmem:[#allocation11 + $0x688] sm:$0xff]  ;;  %v310_v47 = vld [vmem:[#allocation11 + $0x680] sm:$0xff]  ;;  %504 = vmatpush2.msra.mxu1 %v314_v43  ;;  %434 = vmatprep.subr.mxu0 %v183_v44  ;;  %v276_v23 = vld [vmem:[#allocation11 + $0x570] sm:$0xff] }
  0x75   :  { %v179_v48 = vld [vmem:[#allocation11 + $0x268] sm:$0xff]  ;;  %505 = vmatprep.subr.mxu1 %v311_v45  ;;  %v178_v50 = vld [vmem:[#allocation11 + $0x260] sm:$0xff]  ;;  %435 = vmatpush2.msra.mxu0 %v182_v46  ;;  %v145_v24 = vld [vmem:[#allocation11 + $0x158] sm:$0xff] }
  0x76   :  { %v307_v49 = vld [vmem:[#allocation11 + $0x668] sm:$0xff]  ;;  %v306_v51 = vld [vmem:[#allocation11 + $0x660] sm:$0xff]  ;;  %506 = vmatpush2.msra.mxu1 %v310_v47  ;;  %436 = vmatprep.subr.mxu0 %v179_v48  ;;  %v273_v25 = vld [vmem:[#allocation11 + $0x558] sm:$0xff] }
  0x77   :  { %v175_v52 = vld [vmem:[#allocation11 + $0x248] sm:$0xff]  ;;  %507 = vmatprep.subr.mxu1 %v307_v49  ;;  %v174_v54 = vld [vmem:[#allocation11 + $0x240] sm:$0xff]  ;;  %437 = vmatpush2.msra.mxu0 %v178_v50  ;;  %v144_v26 = vld [vmem:[#allocation11 + $0x150] sm:$0xff] }
  0x78   :  { %v303_v53 = vld [vmem:[#allocation11 + $0x648] sm:$0xff]  ;;  %v302_v55 = vld [vmem:[#allocation11 + $0x640] sm:$0xff]  ;;  %508 = vmatpush2.msra.mxu1 %v306_v51  ;;  %438 = vmatprep.subr.mxu0 %v175_v52  ;;  %v272_v27 = vld [vmem:[#allocation11 + $0x550] sm:$0xff] }
  0x79   :  { %v171_v56 = vld [vmem:[#allocation11 + $0x228] sm:$0xff]  ;;  %509 = vmatprep.subr.mxu1 %v303_v53  ;;  %v170_v58 = vld [vmem:[#allocation11 + $0x220] sm:$0xff]  ;;  %439 = vmatpush2.msra.mxu0 %v174_v54  ;;  %v141_v28 = vld [vmem:[#allocation11 + $0x138] sm:$0xff] }
  0x7a   :  { %v299_v57 = vld [vmem:[#allocation11 + $0x628] sm:$0xff]  ;;  %v298_v59 = vld [vmem:[#allocation11 + $0x620] sm:$0xff]  ;;  %510 = vmatpush2.msra.mxu1 %v302_v55  ;;  %440 = vmatprep.subr.mxu0 %v171_v56  ;;  %v269_v29 = vld [vmem:[#allocation11 + $0x538] sm:$0xff] }
  0x7b   :  { %v167_v60 = vld [vmem:[#allocation11 + $0x208] sm:$0xff]  ;;  %511 = vmatprep.subr.mxu1 %v299_v57  ;;  %v166_v62 = vld [vmem:[#allocation11 + $0x200] sm:$0xff]  ;;  %441 = vmatpush2.msra.mxu0 %v170_v58  ;;  %v140_v30 = vld [vmem:[#allocation11 + $0x130] sm:$0xff] }
  0x7c   :  { %v295_v61 = vld [vmem:[#allocation11 + $0x608] sm:$0xff]  ;;  %512 = vmatpush2.msra.mxu1 %v298_v59  ;;  %v294_v0 = vld [vmem:[#allocation11 + $0x600] sm:$0xff]  ;;  %442 = vmatprep.subr.mxu0 %v167_v60  ;;  %v268_v31 = vld [vmem:[#allocation11 + $0x530] sm:$0xff] }
  0x7d   :  { %v1237_v63 = vld [vmem:[#allocation10 + $0x8] sm:$0xff]  ;;  %v1239_v1 = vld [vmem:[#allocation10] sm:$0xff]  ;;  %513 = vmatprep.subr.mxu1 %v295_v61  ;;  %443 = vmatpush2.msra.mxu0 %v166_v62  ;;  %v137_v32 = vld [vmem:[#allocation11 + $0x118] sm:$0xff] }
  0x7e   :  { %444 = vmatprep.mubr.f32.mxu0 %v1237_v63  ;;  %514 = vmatpush2.msra.mxu1 %v294_v0  ;;  %v265_v33 = vld [vmem:[#allocation11 + $0x518] sm:$0xff]  ;;  %v136_v34 = vld [vmem:[#allocation11 + $0x110] sm:$0xff] }
  0x7f   :  { %445 = vmatmul.mubr.f32.vlgmr.msra.gmra.mxu0 %v1239_v1  ;;  %515 = vmatprep.mubr.f32.mxu1 %v1241_v2  ;;  %v264_v35 = vld [vmem:[#allocation11 + $0x510] sm:$0xff]  ;;  %v133_v36 = vld [vmem:[#allocation11 + $0xf8] sm:$0xff] }
  0x80   :  { %522 = vmatprep.subr.mxu0 %v165_v3  ;;  %593 = vmatprep.subr.mxu1 %v293_v4  ;;  %v261_v37 = vld [vmem:[#allocation11 + $0x4f8] sm:$0xff]  ;;  %v132_v38 = vld [vmem:[#allocation11 + $0xf0] sm:$0xff] }
  0x81   :  { %516 = vmatmul.mubr.f32.vlgmr.msra.gmra.mxu1 %v1244_v5  ;;  %523 = vmatpush1.msra.mxu0 %v164_v6  ;;  %v260_v39 = vld [vmem:[#allocation11 + $0x4f0] sm:$0xff]  ;;  %v129_v40 = vld [vmem:[#allocation11 + $0xd8] sm:$0xff] }
  0x82   :  { %594 = vmatpush1.msra.mxu1 %v292_v7  ;;  %524 = vmatprep.subr.mxu0 %v161_v8  ;;  %v257_v41 = vld [vmem:[#allocation11 + $0x4d8] sm:$0xff]  ;;  %v128_v42 = vld [vmem:[#allocation11 + $0xd0] sm:$0xff] }
  0x83   :  { %595 = vmatprep.subr.mxu1 %v289_v9  ;;  %525 = vmatpush1.msra.mxu0 %v160_v10  ;;  %v256_v43 = vld [vmem:[#allocation11 + $0x4d0] sm:$0xff]  ;;  %v125_v44 = vld [vmem:[#allocation11 + $0xb8] sm:$0xff] }
  0x84   :  { %596 = vmatpush1.msra.mxu1 %v288_v11  ;;  %526 = vmatprep.subr.mxu0 %v157_v12  ;;  %v253_v45 = vld [vmem:[#allocation11 + $0x4b8] sm:$0xff]  ;;  %v124_v46 = vld [vmem:[#allocation11 + $0xb0] sm:$0xff] }
  0x85   :  { %597 = vmatprep.subr.mxu1 %v285_v13  ;;  %527 = vmatpush1.msra.mxu0 %v156_v14  ;;  %v252_v47 = vld [vmem:[#allocation11 + $0x4b0] sm:$0xff]  ;;  %v121_v48 = vld [vmem:[#allocation11 + $0x98] sm:$0xff] }
  0x86   :  { %598 = vmatpush1.msra.mxu1 %v284_v15  ;;  %528 = vmatprep.subr.mxu0 %v153_v16  ;;  %v249_v49 = vld [vmem:[#allocation11 + $0x498] sm:$0xff]  ;;  %v120_v50 = vld [vmem:[#allocation11 + $0x90] sm:$0xff] }
  0x87   :  { %599 = vmatprep.subr.mxu1 %v281_v17  ;;  %529 = vmatpush1.msra.mxu0 %v152_v18  ;;  %v248_v51 = vld [vmem:[#allocation11 + $0x490] sm:$0xff]  ;;  %v117_v52 = vld [vmem:[#allocation11 + $0x78] sm:$0xff] }
  0x88   :  { %600 = vmatpush1.msra.mxu1 %v280_v19  ;;  %530 = vmatprep.subr.mxu0 %v149_v20  ;;  %v245_v53 = vld [vmem:[#allocation11 + $0x478] sm:$0xff]  ;;  %v116_v54 = vld [vmem:[#allocation11 + $0x70] sm:$0xff] }
  0x89   :  { %601 = vmatprep.subr.mxu1 %v277_v21  ;;  %531 = vmatpush1.msra.mxu0 %v148_v22  ;;  %v244_v55 = vld [vmem:[#allocation11 + $0x470] sm:$0xff]  ;;  %v113_v56 = vld [vmem:[#allocation11 + $0x58] sm:$0xff] }
  0x8a   :  { %602 = vmatpush1.msra.mxu1 %v276_v23  ;;  %532 = vmatprep.subr.mxu0 %v145_v24  ;;  %v241_v57 = vld [vmem:[#allocation11 + $0x458] sm:$0xff]  ;;  %v112_v58 = vld [vmem:[#allocation11 + $0x50] sm:$0xff] }
  0x8b   :  { %603 = vmatprep.subr.mxu1 %v273_v25  ;;  %533 = vmatpush1.msra.mxu0 %v144_v26  ;;  %v240_v59 = vld [vmem:[#allocation11 + $0x450] sm:$0xff]  ;;  %v109_v60 = vld [vmem:[#allocation11 + $0x38] sm:$0xff] }
  0x8c   :  { %604 = vmatpush1.msra.mxu1 %v272_v27  ;;  %534 = vmatprep.subr.mxu0 %v141_v28  ;;  %v237_v61 = vld [vmem:[#allocation11 + $0x438] sm:$0xff]  ;;  %v108_v62 = vld [vmem:[#allocation11 + $0x30] sm:$0xff] }
  0x8d   :  { %605 = vmatprep.subr.mxu1 %v269_v29  ;;  %535 = vmatpush1.msra.mxu0 %v140_v30  ;;  %v236_v0 = vld [vmem:[#allocation11 + $0x430] sm:$0xff]  ;;  %v105_v3 = vld [vmem:[#allocation11 + $0x18] sm:$0xff] }
  0x8e   :  { %606 = vmatpush1.msra.mxu1 %v268_v31  ;;  %536 = vmatprep.subr.mxu0 %v137_v32  ;;  %v233_v4 = vld [vmem:[#allocation11 + $0x418] sm:$0xff]  ;;  %v104_v6 = vld [vmem:[#allocation11 + $0x10] sm:$0xff] }
  0x8f   :  { %607 = vmatprep.subr.mxu1 %v265_v33  ;;  %537 = vmatpush1.msra.mxu0 %v136_v34  ;;  %v232_v7 = vld [vmem:[#allocation11 + $0x410] sm:$0xff]  ;;  %v229_v8 = vld [vmem:[#allocation11 + $0x3f8] sm:$0xff] }
  0x90   :  { %608 = vmatpush1.msra.mxu1 %v264_v35  ;;  %538 = vmatprep.subr.mxu0 %v133_v36  ;;  %v357_v9 = vld [vmem:[#allocation11 + $0x7f8] sm:$0xff]  ;;  %v228_v10 = vld [vmem:[#allocation11 + $0x3f0] sm:$0xff] }
  0x91   :  { %609 = vmatprep.subr.mxu1 %v261_v37  ;;  %539 = vmatpush1.msra.mxu0 %v132_v38  ;;  %v356_v11 = vld [vmem:[#allocation11 + $0x7f0] sm:$0xff]  ;;  %v225_v12 = vld [vmem:[#allocation11 + $0x3d8] sm:$0xff] }
  0x92   :  { %610 = vmatpush1.msra.mxu1 %v260_v39  ;;  %540 = vmatprep.subr.mxu0 %v129_v40  ;;  %v353_v13 = vld [vmem:[#allocation11 + $0x7d8] sm:$0xff]  ;;  %v224_v14 = vld [vmem:[#allocation11 + $0x3d0] sm:$0xff] }
  0x93   :  { %611 = vmatprep.subr.mxu1 %v257_v41  ;;  %541 = vmatpush1.msra.mxu0 %v128_v42  ;;  %v352_v15 = vld [vmem:[#allocation11 + $0x7d0] sm:$0xff]  ;;  %v221_v16 = vld [vmem:[#allocation11 + $0x3b8] sm:$0xff] }
  0x94   :  { %612 = vmatpush1.msra.mxu1 %v256_v43  ;;  %542 = vmatprep.subr.mxu0 %v125_v44  ;;  %v349_v17 = vld [vmem:[#allocation11 + $0x7b8] sm:$0xff]  ;;  %v220_v18 = vld [vmem:[#allocation11 + $0x3b0] sm:$0xff] }
  0x95   :  { %613 = vmatprep.subr.mxu1 %v253_v45  ;;  %543 = vmatpush1.msra.mxu0 %v124_v46  ;;  %v348_v19 = vld [vmem:[#allocation11 + $0x7b0] sm:$0xff]  ;;  %v217_v20 = vld [vmem:[#allocation11 + $0x398] sm:$0xff] }
  0x96   :  { %614 = vmatpush1.msra.mxu1 %v252_v47  ;;  %544 = vmatprep.subr.mxu0 %v121_v48  ;;  %v345_v21 = vld [vmem:[#allocation11 + $0x798] sm:$0xff]  ;;  %v216_v22 = vld [vmem:[#allocation11 + $0x390] sm:$0xff] }
  0x97   :  { %615 = vmatprep.subr.mxu1 %v249_v49  ;;  %545 = vmatpush1.msra.mxu0 %v120_v50  ;;  %v344_v23 = vld [vmem:[#allocation11 + $0x790] sm:$0xff]  ;;  %v213_v24 = vld [vmem:[#allocation11 + $0x378] sm:$0xff] }
  0x98   :  { %616 = vmatpush1.msra.mxu1 %v248_v51  ;;  %546 = vmatprep.subr.mxu0 %v117_v52  ;;  %v341_v25 = vld [vmem:[#allocation11 + $0x778] sm:$0xff]  ;;  %v212_v26 = vld [vmem:[#allocation11 + $0x370] sm:$0xff] }
  0x99   :  { %617 = vmatprep.subr.mxu1 %v245_v53  ;;  %547 = vmatpush1.msra.mxu0 %v116_v54  ;;  %v340_v27 = vld [vmem:[#allocation11 + $0x770] sm:$0xff]  ;;  %v209_v28 = vld [vmem:[#allocation11 + $0x358] sm:$0xff] }
  0x9a   :  { %618 = vmatpush1.msra.mxu1 %v244_v55  ;;  %548 = vmatprep.subr.mxu0 %v113_v56  ;;  %v337_v29 = vld [vmem:[#allocation11 + $0x758] sm:$0xff]  ;;  %v208_v30 = vld [vmem:[#allocation11 + $0x350] sm:$0xff] }
  0x9b   :  { %619 = vmatprep.subr.mxu1 %v241_v57  ;;  %549 = vmatpush1.msra.mxu0 %v112_v58  ;;  %v336_v31 = vld [vmem:[#allocation11 + $0x750] sm:$0xff]  ;;  %v205_v32 = vld [vmem:[#allocation11 + $0x338] sm:$0xff] }
  0x9c   :  { %620 = vmatpush1.msra.mxu1 %v240_v59  ;;  %550 = vmatprep.subr.mxu0 %v109_v60  ;;  %v333_v33 = vld [vmem:[#allocation11 + $0x738] sm:$0xff]  ;;  %v204_v34 = vld [vmem:[#allocation11 + $0x330] sm:$0xff] }
  0x9d   :  { %621 = vmatprep.subr.mxu1 %v237_v61  ;;  %551 = vmatpush1.msra.mxu0 %v108_v62  ;;  %v332_v35 = vld [vmem:[#allocation11 + $0x730] sm:$0xff]  ;;  %v201_v36 = vld [vmem:[#allocation11 + $0x318] sm:$0xff] }
  0x9e   :  { %622 = vmatpush1.msra.mxu1 %v236_v0  ;;  %552 = vmatprep.subr.mxu0 %v105_v3  ;;  %v329_v37 = vld [vmem:[#allocation11 + $0x718] sm:$0xff]  ;;  %v200_v38 = vld [vmem:[#allocation11 + $0x310] sm:$0xff] }
  0x9f   :  { %623 = vmatprep.subr.mxu1 %v233_v4  ;;  %553 = vmatpush1.msra.mxu0 %v104_v6  ;;  %v328_v39 = vld [vmem:[#allocation11 + $0x710] sm:$0xff]  ;;  %v197_v40 = vld [vmem:[#allocation11 + $0x2f8] sm:$0xff] }
  0xa0   :  { %624 = vmatpush1.msra.mxu1 %v232_v7  ;;  %554 = vmatprep.subr.mxu0 %v229_v8  ;;  %v325_v41 = vld [vmem:[#allocation11 + $0x6f8] sm:$0xff]  ;;  %v196_v42 = vld [vmem:[#allocation11 + $0x2f0] sm:$0xff] }
  0xa1   :  { %625 = vmatprep.subr.mxu1 %v357_v9  ;;  %555 = vmatpush2.msra.mxu0 %v228_v10  ;;  %v324_v43 = vld [vmem:[#allocation11 + $0x6f0] sm:$0xff]  ;;  %v193_v44 = vld [vmem:[#allocation11 + $0x2d8] sm:$0xff] }
  0xa2   :  { %626 = vmatpush2.msra.mxu1 %v356_v11  ;;  %556 = vmatprep.subr.mxu0 %v225_v12  ;;  %v321_v45 = vld [vmem:[#allocation11 + $0x6d8] sm:$0xff]  ;;  %v192_v46 = vld [vmem:[#allocation11 + $0x2d0] sm:$0xff]  ;;  %v729_v12 = vld [vmem:[#allocation13 + $0x1e8] sm:$0xff] }
  0xa3   :  { %627 = vmatprep.subr.mxu1 %v353_v13  ;;  %557 = vmatpush2.msra.mxu0 %v224_v14  ;;  %v320_v47 = vld [vmem:[#allocation11 + $0x6d0] sm:$0xff]  ;;  %v189_v48 = vld [vmem:[#allocation11 + $0x2b8] sm:$0xff]  ;;  %v728_v14 = vld [vmem:[#allocation13 + $0x1e0] sm:$0xff] }
  0xa4   :  { %628 = vmatpush2.msra.mxu1 %v352_v15  ;;  %558 = vmatprep.subr.mxu0 %v221_v16  ;;  %v317_v49 = vld [vmem:[#allocation11 + $0x6b8] sm:$0xff]  ;;  %v188_v50 = vld [vmem:[#allocation11 + $0x2b0] sm:$0xff]  ;;  %v725_v16 = vld [vmem:[#allocation13 + $0x1c8] sm:$0xff] }
  0xa5   :  { %629 = vmatprep.subr.mxu1 %v349_v17  ;;  %559 = vmatpush2.msra.mxu0 %v220_v18  ;;  %v316_v51 = vld [vmem:[#allocation11 + $0x6b0] sm:$0xff]  ;;  %v185_v52 = vld [vmem:[#allocation11 + $0x298] sm:$0xff]  ;;  %v724_v18 = vld [vmem:[#allocation13 + $0x1c0] sm:$0xff] }
  0xa6   :  { %630 = vmatpush2.msra.mxu1 %v348_v19  ;;  %560 = vmatprep.subr.mxu0 %v217_v20  ;;  %v313_v53 = vld [vmem:[#allocation11 + $0x698] sm:$0xff]  ;;  %v184_v54 = vld [vmem:[#allocation11 + $0x290] sm:$0xff]  ;;  %v721_v20 = vld [vmem:[#allocation13 + $0x1a8] sm:$0xff] }
  0xa7   :  { %631 = vmatprep.subr.mxu1 %v345_v21  ;;  %561 = vmatpush2.msra.mxu0 %v216_v22  ;;  %v312_v55 = vld [vmem:[#allocation11 + $0x690] sm:$0xff]  ;;  %v181_v56 = vld [vmem:[#allocation11 + $0x278] sm:$0xff]  ;;  %v720_v21 = vld [vmem:[#allocation13 + $0x1a0] sm:$0xff] }
  0xa8   :  { %632 = vmatpush2.msra.mxu1 %v344_v23  ;;  %562 = vmatprep.subr.mxu0 %v213_v24  ;;  %v309_v57 = vld [vmem:[#allocation11 + $0x678] sm:$0xff]  ;;  %v180_v58 = vld [vmem:[#allocation11 + $0x270] sm:$0xff]  ;;  %v717_v22 = vld [vmem:[#allocation13 + $0x188] sm:$0xff] }
  0xa9   :  { %633 = vmatprep.subr.mxu1 %v341_v25  ;;  %563 = vmatpush2.msra.mxu0 %v212_v26  ;;  %v308_v59 = vld [vmem:[#allocation11 + $0x670] sm:$0xff]  ;;  %v177_v60 = vld [vmem:[#allocation11 + $0x258] sm:$0xff]  ;;  %v716_v23 = vld [vmem:[#allocation13 + $0x180] sm:$0xff] }
  0xaa   :  { %634 = vmatpush2.msra.mxu1 %v340_v27  ;;  %564 = vmatprep.subr.mxu0 %v209_v28  ;;  %v305_v61 = vld [vmem:[#allocation11 + $0x658] sm:$0xff]  ;;  %v176_v62 = vld [vmem:[#allocation11 + $0x250] sm:$0xff]  ;;  %v712_v26 = vld [vmem:[#allocation13 + $0x160] sm:$0xff] }
  0xab   :  { %635 = vmatprep.subr.mxu1 %v337_v29  ;;  %565 = vmatpush2.msra.mxu0 %v208_v30  ;;  %v304_v0 = vld [vmem:[#allocation11 + $0x650] sm:$0xff]  ;;  %v173_v3 = vld [vmem:[#allocation11 + $0x238] sm:$0xff]  ;;  %v709_v28 = vld [vmem:[#allocation13 + $0x148] sm:$0xff] }
  0xac   :  { %636 = vmatpush2.msra.mxu1 %v336_v31  ;;  %566 = vmatprep.subr.mxu0 %v205_v32  ;;  %v301_v4 = vld [vmem:[#allocation11 + $0x638] sm:$0xff]  ;;  %v172_v6 = vld [vmem:[#allocation11 + $0x230] sm:$0xff]  ;;  %v708_v30 = vld [vmem:[#allocation13 + $0x140] sm:$0xff] }
  0xad   :  { %637 = vmatprep.subr.mxu1 %v333_v33  ;;  %567 = vmatpush2.msra.mxu0 %v204_v34  ;;  %v300_v7 = vld [vmem:[#allocation11 + $0x630] sm:$0xff]  ;;  %v169_v8 = vld [vmem:[#allocation11 + $0x218] sm:$0xff]  ;;  %v705_v32 = vld [vmem:[#allocation13 + $0x128] sm:$0xff] }
  0xae   :  { %638 = vmatpush2.msra.mxu1 %v332_v35  ;;  %568 = vmatprep.subr.mxu0 %v201_v36  ;;  %v297_v9 = vld [vmem:[#allocation11 + $0x618] sm:$0xff]  ;;  %v168_v10 = vld [vmem:[#allocation11 + $0x210] sm:$0xff]  ;;  %v704_v34 = vld [vmem:[#allocation13 + $0x120] sm:$0xff] }
  0xaf   :  { %639 = vmatprep.subr.mxu1 %v329_v37  ;;  %569 = vmatpush2.msra.mxu0 %v200_v38  ;;  %v296_v11 = vld [vmem:[#allocation11 + $0x610] sm:$0xff]  ;;  %v731_v13 = vld [vmem:[#allocation13 + $0x1f8] sm:$0xff]  ;;  %v701_v36 = vld [vmem:[#allocation13 + $0x108] sm:$0xff] }
  0xb0   :  { %640 = vmatpush2.msra.mxu1 %v328_v39  ;;  %570 = vmatprep.subr.mxu0 %v197_v40  ;;  %v730_v15 = vld [vmem:[#allocation13 + $0x1f0] sm:$0xff]  ;;  %v727_v17 = vld [vmem:[#allocation13 + $0x1d8] sm:$0xff]  ;;  %v700_v38 = vld [vmem:[#allocation13 + $0x100] sm:$0xff] }
  0xb1   :  { %641 = vmatprep.subr.mxu1 %v325_v41  ;;  %571 = vmatpush2.msra.mxu0 %v196_v42  ;;  %v726_v19 = vld [vmem:[#allocation13 + $0x1d0] sm:$0xff]  ;;  %v715_v25 = vld [vmem:[#allocation13 + $0x178] sm:$0xff]  ;;  %v697_v40 = vld [vmem:[#allocation13 + $0xe8] sm:$0xff] }
  0xb2   :  { %642 = vmatpush2.msra.mxu1 %v324_v43  ;;  %572 = vmatprep.subr.mxu0 %v193_v44  ;;  %v718_v24 = vld [vmem:[#allocation13 + $0x190] sm:$0xff]  ;;  %v711_v29 = vld [vmem:[#allocation13 + $0x158] sm:$0xff]  ;;  %v696_v42 = vld [vmem:[#allocation13 + $0xe0] sm:$0xff] }
  0xb3   :  { %643 = vmatprep.subr.mxu1 %v321_v45  ;;  %573 = vmatpush2.msra.mxu0 %v192_v46  ;;  %v714_v27 = vld [vmem:[#allocation13 + $0x170] sm:$0xff]  ;;  %v707_v33 = vld [vmem:[#allocation13 + $0x138] sm:$0xff]  ;;  %v693_v44 = vld [vmem:[#allocation13 + $0xc8] sm:$0xff] }
  0xb4   :  { %644 = vmatpush2.msra.mxu1 %v320_v47  ;;  %574 = vmatprep.subr.mxu0 %v189_v48  ;;  %v710_v31 = vld [vmem:[#allocation13 + $0x150] sm:$0xff]  ;;  %v703_v37 = vld [vmem:[#allocation13 + $0x118] sm:$0xff]  ;;  %v692_v46 = vld [vmem:[#allocation13 + $0xc0] sm:$0xff] }
  0xb5   :  { %645 = vmatprep.subr.mxu1 %v317_v49  ;;  %575 = vmatpush2.msra.mxu0 %v188_v50  ;;  %v706_v35 = vld [vmem:[#allocation13 + $0x130] sm:$0xff]  ;;  %v699_v41 = vld [vmem:[#allocation13 + $0xf8] sm:$0xff]  ;;  %v689_v48 = vld [vmem:[#allocation13 + $0xa8] sm:$0xff] }
  0xb6   :  { %646 = vmatpush2.msra.mxu1 %v316_v51  ;;  %576 = vmatprep.subr.mxu0 %v185_v52  ;;  %v702_v39 = vld [vmem:[#allocation13 + $0x110] sm:$0xff]  ;;  %v695_v45 = vld [vmem:[#allocation13 + $0xd8] sm:$0xff]  ;;  %v688_v50 = vld [vmem:[#allocation13 + $0xa0] sm:$0xff] }
  0xb7   :  { %647 = vmatprep.subr.mxu1 %v313_v53  ;;  %577 = vmatpush2.msra.mxu0 %v184_v54  ;;  %v698_v43 = vld [vmem:[#allocation13 + $0xf0] sm:$0xff]  ;;  %v691_v49 = vld [vmem:[#allocation13 + $0xb8] sm:$0xff]  ;;  %v685_v52 = vld [vmem:[#allocation13 + $0x88] sm:$0xff] }
  0xb8   :  { %648 = vmatpush2.msra.mxu1 %v312_v55  ;;  %578 = vmatprep.subr.mxu0 %v181_v56  ;;  %v694_v47 = vld [vmem:[#allocation13 + $0xd0] sm:$0xff]  ;;  %v687_v53 = vld [vmem:[#allocation13 + $0x98] sm:$0xff]  ;;  %v684_v54 = vld [vmem:[#allocation13 + $0x80] sm:$0xff] }
  0xb9   :  { %649 = vmatprep.subr.mxu1 %v309_v57  ;;  %579 = vmatpush2.msra.mxu0 %v180_v58  ;;  %v690_v51 = vld [vmem:[#allocation13 + $0xb0] sm:$0xff]  ;;  %v681_v56 = vld [vmem:[#allocation13 + $0x68] sm:$0xff]  ;;  %v683_v57 = vld [vmem:[#allocation13 + $0x78] sm:$0xff] }
  0xba   :  { %650 = vmatpush2.msra.mxu1 %v308_v59  ;;  %580 = vmatprep.subr.mxu0 %v177_v60  ;;  %v686_v55 = vld [vmem:[#allocation13 + $0x90] sm:$0xff]  ;;  %v680_v58 = vld [vmem:[#allocation13 + $0x60] sm:$0xff]  ;;  %v677_v60 = vld [vmem:[#allocation13 + $0x48] sm:$0xff] }
  0xbb   :  { %651 = vmatprep.subr.mxu1 %v305_v61  ;;  %581 = vmatpush2.msra.mxu0 %v176_v62  ;;  %v682_v59 = vld [vmem:[#allocation13 + $0x70] sm:$0xff]  ;;  %v679_v61 = vld [vmem:[#allocation13 + $0x58] sm:$0xff]  ;;  %v676_v62 = vld [vmem:[#allocation13 + $0x40] sm:$0xff] }
  0xbc   :  { %652 = vmatpush2.msra.mxu1 %v304_v0  ;;  %582 = vmatprep.subr.mxu0 %v173_v3  ;;  %v678_v0 = vld [vmem:[#allocation13 + $0x50] sm:$0xff]  ;;  %v673_v3 = vld [vmem:[#allocation13 + $0x28] sm:$0xff] }
  0xbd   :  { %653 = vmatprep.subr.mxu1 %v301_v4  ;;  %583 = vmatpush2.msra.mxu0 %v172_v6  ;;  %v675_v4 = vld [vmem:[#allocation13 + $0x38] sm:$0xff]  ;;  %v672_v6 = vld [vmem:[#allocation13 + $0x20] sm:$0xff] }
  0xbe   :  { %654 = vmatpush2.msra.mxu1 %v300_v7  ;;  %584 = vmatprep.subr.mxu0 %v169_v8  ;;  %v674_v7 = vld [vmem:[#allocation13 + $0x30] sm:$0xff]  ;;  %v669_v8 = vld [vmem:[#allocation13 + $0x8] sm:$0xff] }
  0xbf   :  { %655 = vmatprep.subr.mxu1 %v297_v9  ;;  %585 = vmatpush2.msra.mxu0 %v168_v10  ;;  %v671_v9 = vld [vmem:[#allocation13 + $0x18] sm:$0xff]  ;;  %v668_v10 = vld [vmem:[#allocation13] sm:$0xff] }
  0xc0   :  { %586 = vmatprep.mubr.f32.mxu0 %v1237_v63  ;;  %656 = vmatpush2.msra.mxu1 %v296_v11  ;;  %v723_v63 = vld [vmem:[#allocation13 + $0x1b8] sm:$0xff]  ;;  %v670_v11 = vld [vmem:[#allocation13 + $0x10] sm:$0xff] }
  0xc1   :  { %587 = vmatmul.mubr.f32.vlgmr.msra.gmra.mxu0 %v1239_v1  ;;  %657 = vmatprep.mubr.f32.mxu1 %v1241_v2  ;;  %v722_v1 = vld [vmem:[#allocation13 + $0x1b0] sm:$0xff]  ;;  %v719_v2 = vld [vmem:[#allocation13 + $0x198] sm:$0xff] }
  0xc2   :  { %738 = vmatprep.subr.mxu0 %v729_v12  ;;  %809 = vmatprep.subr.mxu1 %v731_v13  ;;  %v94_v12 = vld [vmem:[#allocation5] sm:$0xff]  ;;  %v1167_v13 = vmov 0.0  }
  0xc3   :  { %658 = vmatmul.mubr.f32.vlgmr.msra.gmra.mxu1 %v1244_v5  ;;  %739 = vmatpush1.msra.mxu0 %v728_v14  ;;  %v713_v5 = vld [vmem:[#allocation13 + $0x168] sm:$0xff]  ;;  %v360_v14 = vlaneseq }
  0xc4   :  { %810 = vmatpush1.msra.mxu1 %v730_v15  ;;  %740 = vmatprep.subr.mxu0 %v725_v16 }
  0xc5   :  { %811 = vmatprep.subr.mxu1 %v727_v17  ;;  %741 = vmatpush1.msra.mxu0 %v724_v18  ;;  %v361_v15 = vshrl.u32 %v360_v14, 7  ;;  %v358_v17 = vld [vmem:[%s1270_s5] sm:$0xf]  ;;  %s1168_s5 = smov [#allocation15]  }
  0xc6   :  { %812 = vmatpush1.msra.mxu1 %v726_v19  ;;  %742 = vmatprep.subr.mxu0 %v721_v20  ;;  %s932_s29 = sshll.u32 %s1168_s5, 4  ;;  %s933_s29 = int_to_ptr.vmem [resolvable:$true] %s932_s29 }
  0xc7   :  { %813 = vmatprep.subr.mxu1 %v723_v63  ;;  %743 = vmatpush1.msra.mxu0 %v720_v21  ;;  %v362_v16 = vsub.s32 0, %v361_v15  ;;  %v366_v19 = vsub.s32 1, %v361_v15  ;;  %s1090_s12 = scalar_lea.vmem %s933_s29, 128  ;;  %p1095_p12 = scmp.lt.s32.totalorder %s933_s29, %s933_s29 }
  0xc8   :  { %814 = vmatpush1.msra.mxu1 %v722_v1  ;;  %744 = vmatprep.subr.mxu0 %v717_v22  ;;  %p1091_p11 = scmp.ne.s32.totalorder %s933_s29, %s1090_s12  ;;  %p1096_p13 = scmp.lt.s32.totalorder %s1090_s12, %s1090_s12 }
  0xc9   :  { %815 = vmatprep.subr.mxu1 %v719_v2  ;;  %745 = vmatpush1.msra.mxu0 %v716_v23  ;;  %v363_v20 = vrot.slane %v358_v17, %v362_v16  ;;  %v367_v21 = vrot.slane %v358_v17, %v366_v19 }
  0xca   :  { %816 = vmatpush1.msra.mxu1 %v718_v24  ;;  %746 = vmatprep.subr.mxu0 %v713_v5  ;;  %v370_v5 = vsub.s32 2, %v361_v15  ;;  %p1097_p0 = por %p1096_p13, %p1095_p12 }
  0xcb   :  { %817 = vmatprep.subr.mxu1 %v715_v25  ;;  %747 = vmatpush1.msra.mxu0 %v712_v26 }
  0xcc   :  { %818 = vmatpush1.msra.mxu1 %v714_v27  ;;  %748 = vmatprep.subr.mxu0 %v709_v28  ;;  %p1098_p1 = pnand %p1097_p0, %p1091_p11 }
  0xcd   :  { %819 = vmatprep.subr.mxu1 %v711_v29  ;;  %749 = vmatpush1.msra.mxu0 %v708_v30  ;;  %v371_v30 = vrot.slane %v358_v17, %v370_v5 }
  0xce   :  { %820 = vmatpush1.msra.mxu1 %v710_v31  ;;  %750 = vmatprep.subr.mxu0 %v705_v32 }
  0xcf   :  { %821 = vmatprep.subr.mxu1 %v707_v33  ;;  %751 = vmatpush1.msra.mxu0 %v704_v34 }
  0xd0   :  { %822 = vmatpush1.msra.mxu1 %v706_v35  ;;  %752 = vmatprep.subr.mxu0 %v701_v36  ;;  %v374_v35 = vsub.s32 3, %v361_v15 }
  0xd1   :  { %823 = vmatprep.subr.mxu1 %v703_v37  ;;  %753 = vmatpush1.msra.mxu0 %v700_v38 }
  0xd2   :  { %824 = vmatpush1.msra.mxu1 %v702_v39  ;;  %754 = vmatprep.subr.mxu0 %v697_v40  ;;  %v375_v39 = vrot.slane %v358_v17, %v374_v35 }
  0xd3   :  { %825 = vmatprep.subr.mxu1 %v699_v41  ;;  %755 = vmatpush1.msra.mxu0 %v696_v42 }
  0xd4   :  { %826 = vmatpush1.msra.mxu1 %v698_v43  ;;  %756 = vmatprep.subr.mxu0 %v693_v44 }
  0xd5   :  { %827 = vmatprep.subr.mxu1 %v695_v45  ;;  %757 = vmatpush1.msra.mxu0 %v692_v46 }
  0xd6   :  { %828 = vmatpush1.msra.mxu1 %v694_v47  ;;  %758 = vmatprep.subr.mxu0 %v689_v48 }
  0xd7   :  { %829 = vmatprep.subr.mxu1 %v691_v49  ;;  %759 = vmatpush1.msra.mxu0 %v688_v50 }
  0xd8   :  { %830 = vmatpush1.msra.mxu1 %v690_v51  ;;  %760 = vmatprep.subr.mxu0 %v685_v52 }
  0xd9   :  { %831 = vmatprep.subr.mxu1 %v687_v53  ;;  %761 = vmatpush1.msra.mxu0 %v684_v54  ;;  %v96_v54 = vld [vmem:[#allocation8] sm:$0xff] }
  0xda   :  { %832 = vmatpush1.msra.mxu1 %v686_v55  ;;  %762 = vmatprep.subr.mxu0 %v681_v56 }
  0xdb   :  { %833 = vmatprep.subr.mxu1 %v683_v57  ;;  %763 = vmatpush1.msra.mxu0 %v680_v58 }
  0xdc   :  { %834 = vmatpush1.msra.mxu1 %v682_v59  ;;  %764 = vmatprep.subr.mxu0 %v677_v60 }
  0xdd   :  { %835 = vmatprep.subr.mxu1 %v679_v61  ;;  %765 = vmatpush1.msra.mxu0 %v676_v62 }
  0xde   :  { %836 = vmatpush1.msra.mxu1 %v678_v0  ;;  %766 = vmatprep.subr.mxu0 %v673_v3 }
  0xdf   :  { %837 = vmatprep.subr.mxu1 %v675_v4  ;;  %767 = vmatpush1.msra.mxu0 %v672_v6 }
  0xe0   :  { %838 = vmatpush1.msra.mxu1 %v674_v7  ;;  %768 = vmatprep.subr.mxu0 %v669_v8 }
  0xe1   :  { %839 = vmatprep.subr.mxu1 %v671_v9  ;;  %769 = vmatpush1.msra.mxu0 %v668_v10 }
  0xe2   :  { %802 = vmatprep.mubr.f32.mxu0 %v1167_v13  ;;  %840 = vmatpush1.msra.mxu1 %v670_v11 }
  0xe3   :  { %873 = vmatprep.mubr.f32.mxu1 %v1167_v13  ;;  %803 = vmatmul.mubr.f32.vlgmr.msra.gmra.mxu0 %v94_v12 }
  0xe4   :  { %874 = vmatmul.mubr.f32.vlgmr.msra.gmra.mxu1 %v94_v12 }
 0x13f   :  { %v446_v18 = vpop.f32.mrf.mxu0 }
 0x140   :  { %v447_v2 = vadd.f32 %v446_v18, %v363_v20 }
 0x141   :  { %v448_v63 = vpop.f32.mrf.mxu0  ;;  %v517_v1 = vpop.f32.mrf.mxu1 }
 0x142   :  { %v449_v23 = vadd.f32 %v448_v63, %v367_v21  ;;  %v518_v26 = vadd.f32 %v517_v1, %v447_v2 }
 0x143   :  { %v519_v24 = vpop.f32.mrf.mxu1 }
 0x144   :  { %v520_v28 = vadd.f32 %v519_v24, %v449_v23 }
 0x181   :  { %v588_v22 = vpop.f32.mrf.mxu0 }
 0x182   :  { %v589_v37 = vadd.f32 %v588_v22, %v371_v30 }
 0x183   :  { %v590_v25 = vpop.f32.mrf.mxu0  ;;  %v659_v32 = vpop.f32.mrf.mxu1 }
 0x184   :  { %v660_v41 = vadd.f32 %v659_v32, %v589_v37  ;;  %v591_v42 = vadd.f32 %v590_v25, %v375_v39 }
 0x185   :  { %v661_v38 = vpop.f32.mrf.mxu1 }
 0x186   :  { %v662_v45 = vadd.f32 %v661_v38, %v591_v42 }
 0x1a3   :  { %v804_v27 = vpop.f32.mrf.mxu0 }
 0x1a4   :  { %v880_v29 = vadd.f32 %v804_v27, %v518_v26  ;;  %v875_v40 = vpop.f32.mrf.mxu1 }
 0x1a5   :  { %v806_v31 = vpop.f32.mrf.mxu0  ;;  %v882_v43 = vadd.f32 %v875_v40, %v660_v41 }
 0x1a6   :  { %v960_v33 = vmul.f32 -1.442695, %v880_v29  ;;  %v881_v34 = vadd.f32 %v806_v31, %v520_v28  ;;  %v877_v44 = vpop.f32.mrf.mxu1 }
 0x1a7   :  { %v962_v46 = vmul.f32 -1.442695, %v882_v43  ;;  %v883_v48 = vadd.f32 %v877_v44, %v662_v45 }
 0x1a8   :  { %974 = vpow2.f32 %v960_v33  ;;  %v961_v36 = vmul.f32 -1.442695, %v881_v34 }
 0x1aa   :  { %976 = vpow2.f32 %v961_v36 }
 0x1ab   :  { %978 = vpow2.f32 %v962_v46 }
 0x1b5   :  { %v975_v47 = vpop.eup %974 }
 0x1b6   :  { %v893_v49 = vadd.f32 1.0, %v975_v47 }
 0x1b7   :  { %v977_v50 = vpop.eup %976 }
 0x1b8   :  { %980 = vrcp.f32 %v893_v49  ;;  %v894_v51 = vadd.f32 1.0, %v977_v50  ;;  %v979_v52 = vpop.eup %978 }
 0x1b9   :  { %982 = vtanh.f32 %v883_v48  ;;  %v895_v57 = vadd.f32 1.0, %v979_v52 }
 0x1ba   :  { %984 = vrcp.f32 %v894_v51 }
 0x1bb   :  { %986 = vrcp.f32 %v895_v57 }
 0x1c5   :  { %v981_v53 = vpop.eup %980 }
 0x1c6   :  { %v983_v55 = vpop.eup %982 }
 0x1c7   :  { %v985_v56 = vpop.eup %984  ;;  %v904_v59 = vmul.f32 %v983_v55, %v981_v53 }
 0x1c8   :  { %v903_v58 = vmul.f32 %v985_v56, %v96_v54  ;;  %v987_v61 = vpop.eup %986 }
 0x1ca   :  { %v905_v60 = vadd.f32 %v904_v59, %v903_v58 }
 0x1cc   :  { %915 = vst [vmem:[#allocation17] sm:$0xff] %v905_v60  ;;  %988 = vtanh.f32 %v905_v60 }
 0x1d9   :  { %v989_v62 = vpop.eup %988 }
 0x1da   :  { %v907_v0 = vmul.f32 %v989_v62, %v987_v61 }
 0x1dc   :  { %914 = vst [vmem:[#allocation15] sm:$0xff] %v907_v0  ;;  %908 = vst [vmem:[#allocation14] sm:$0xff] %v907_v0 }
 0x1dd   :  { %1101 = shalt.err (!%p1098_p1)
}
 0x1de   :  { %935 = dma.vmem_to_hbm [thread:$0]  %s933_s29, 128, %s1272_s7, [#allocation16]  }
 0x1df   :  { %s1110_s15 = scalar_lea.vmem %s923_s9, 128  ;;  %p1115_p3 = scmp.lt.s32.totalorder %s923_s9, %s923_s9 }
 0x1e0   :  { %p1111_p2 = scmp.ne.s32.totalorder %s923_s9, %s1110_s15  ;;  %p1116_p4 = scmp.lt.s32.totalorder %s1110_s15, %s1110_s15 }
 0x1e2   :  { %p1117_p5 = por %p1116_p4, %p1115_p3 }
 0x1e4   :  { %p1118_p6 = pnand %p1117_p5, %p1111_p2 }
 0x1e6   :  { %1121 = shalt.err (!%p1118_p6)
}
 0x1e7   :  { %925 = dma.vmem_to_hbm [thread:$0]  %s923_s9, 128, %s1271_s6, [#allocation7]  }
 0x1e8   :  { %s1130_s18 = scalar_lea.vmem %s943_s11, 128  ;;  %p1135_p8 = scmp.lt.s32.totalorder %s943_s11, %s943_s11 }
 0x1e9   :  { %p1131_p7 = scmp.ne.s32.totalorder %s943_s11, %s1130_s18  ;;  %p1136_p9 = scmp.lt.s32.totalorder %s1130_s18, %s1130_s18 }
 0x1eb   :  { %p1137_p10 = por %p1136_p9, %p1135_p8 }
 0x1ed   :  { %p1138_p11 = pnand %p1137_p10, %p1131_p7 }
 0x1ef   :  { %1141 = shalt.err (!%p1138_p11)
}
 0x1f0   :  { %945 = dma.vmem_to_hbm [thread:$0]  %s943_s11, 128, %s1273_s8, [#allocation16]  }
 0x1f1   :  { %1156 = dma.done.wait [#allocation7], 128  }
 0x1f2   :  { %1157 = vsyncadd [#allocation7], 4294967168 }
 0x1f3   :  { %1158 = dma.done.wait [#allocation16], 256  }
 0x1f4   :  { %1159 = vsyncadd [#allocation16], 4294967040 }
 0x1f5   :  { %955 = vsyncpa [#allocation6], 1 }
 0x1f6   :  { %956 = vsyncpa [#allocation9], 1 }
 0x1f7   :  { %957 = vsyncpa [#allocation12], 1 }
 0x1f8   :  { %958 = vsyncpa [#allocation7], 1 }
 0x1f9   :  { %959 = vsyncpa [#allocation16], 1 }

</bundles_post_ra>
